<compile_context>
chip_gen: v5e
topology: v5e:2x2
jax: 0.10.0
libtpu: 0.0.40
codegen_flags: <defaults>
</compile_context>

<pallas_src>
import jax
import jax.numpy as jnp
from jax.experimental import pallas as pl
from jax.experimental.pallas import tpu as pltpu


def _leaky_relu(x, slope=0.2):
    # For 0 < slope < 1: LeakyReLU(x) == max(x, slope * x)  (mul + max, no select).
    return jnp.maximum(x, slope * x)


def _conv3x3_lane_dense(x_cf, w_mat, b_col, col_ok, H, W):
    """3x3 'same' convolution in lane-dense layout.

    x_cf:   (C, H*W)     activations, spatial flattened onto the lane axis
    w_mat:  (Cout, 9*C)  weights, K ordered as (kh, kw, ci)
    b_col:  (Cout, 1)    bias (lane-broadcast)
    col_ok: {-1: mask, 0: None, +1: mask}  (1, H*W) column-validity masks per dw
    returns (Cout, H*W) float32
    """
    C, HW = x_cf.shape
    pad = W + 1  # enough zero pad for any shift dh*W + dw, |shift| <= W + 1
    zeros = jnp.zeros((C, pad), x_cf.dtype)
    xp = jnp.concatenate([zeros, x_cf, zeros], axis=1)  # (C, HW + 2W + 2)

    taps = []
    for kh in range(3):
        dh = kh - 1
        for kw in range(3):
            dw = kw - 1
            s = pad + dh * W + dw                      # static lane offset
            sl = jax.lax.slice(xp, (0, s), (C, s + HW))  # (C, HW)
            # Vertical (row) borders are already zero via the pad; only the
            # horizontal (column) wrap for dw = +/-1 needs masking.
            if col_ok[dw] is not None:
                sl = jnp.where(col_ok[dw], sl, 0.0)
            taps.append(sl)
    patches = jnp.concatenate(taps, axis=0)            # (9*C, HW) im2col operand

    y = jax.lax.dot_general(
        w_mat, patches, (((1,), (0,)), ((), ())),
        preferred_element_type=jnp.float32)             # (Cout, HW) on the MXU
    return y + b_col


def conv_block_forward(x_nchw, w1_oihw, b1, w2_oihw, b2):
    """x: (N, Cin, H, W); w*: PyTorch OIHW (Cout, Cin/Cout, 3, 3); b*: (Cout,).

    Returns (N, Cout, H, W) = LeakyReLU(conv2(LeakyReLU(conv1(x)))).
    """
    N, Cin, H, W = x_nchw.shape
    Cout = w1_oihw.shape[0]
    HW = H * W

    # Free-reshape glue to the lane-dense kernel layout.
    x_flat = x_nchw.reshape(N, Cin, HW)
    w1_mat = jnp.transpose(w1_oihw, (0, 2, 3, 1)).reshape(Cout, 9 * Cin)
    w2_mat = jnp.transpose(w2_oihw, (0, 2, 3, 1)).reshape(Cout, 9 * Cout)
    b1_col = b1.reshape(Cout, 1)
    b2_col = b2.reshape(Cout, 1)

    def kernel(x_ref, w1_ref, b1_ref, w2_ref, b2_ref, out_ref):
        # Column-validity masks (depend only on dw); computed once per grid
        # step and shared by both convs.  W is a power of two -> cheap AND.
        col = jax.lax.broadcasted_iota(jnp.int32, (1, HW), 1) % W
        col_ok = {-1: col >= 1, 0: None, 1: col <= (W - 2)}

        x = x_ref[0]  # (Cin, HW), already f32 — no cast

        y1 = _leaky_relu(_conv3x3_lane_dense(
            x, w1_ref[...], b1_ref[...], col_ok, H, W))
        y2 = _leaky_relu(_conv3x3_lane_dense(
            y1, w2_ref[...], b2_ref[...], col_ok, H, W))

        # (Cout, HW) = (8, 256): full sublane group, lane-dense -> unmasked vst.
        out_ref[0] = y2.astype(out_ref.dtype)

    flops = 2 * N * HW * 9 * (Cin * Cout + Cout * Cout)
    bytes_accessed = 4 * (x_flat.size + w1_mat.size + w2_mat.size
                          + b1_col.size + b2_col.size + N * Cout * HW)

    # TODO(synk): at real channel counts (>=128) switch MXU operands to bf16
    # (keep f32 accumulation) — irrelevant at Cin=4 / Cout=8.
    out_flat = pl.pallas_call(
        kernel,
        out_shape=jax.ShapeDtypeStruct((N, Cout, HW), x_nchw.dtype),
        grid_spec=pltpu.PrefetchScalarGridSpec(
            num_scalar_prefetch=0,
            grid=(N,),
            in_specs=[
                pl.BlockSpec((1, Cin, HW), lambda n: (n, 0, 0)),
                pl.BlockSpec((Cout, 9 * Cin), lambda n: (0, 0)),
                pl.BlockSpec((Cout, 1), lambda n: (0, 0)),
                pl.BlockSpec((Cout, 9 * Cout), lambda n: (0, 0)),
                pl.BlockSpec((Cout, 1), lambda n: (0, 0)),
            ],
            out_specs=pl.BlockSpec((1, Cout, HW), lambda n: (n, 0, 0)),
        ),
        compiler_params=pltpu.CompilerParams(
            dimension_semantics=("parallel",)),
        cost_estimate=pl.CostEstimate(
            flops=flops, transcendentals=0, bytes_accessed=bytes_accessed),
    )(x_flat, w1_mat, b1_col, w2_mat, b2_col)

    return out_flat.reshape(N, Cout, H, W)


def _reference_forward(x_nchw, w1_oihw, b1, w2_oihw, b2):
    """Pure-JAX reference (lax.conv) for validation."""
    def conv(x, w, b):
        y = jax.lax.conv_general_dilated(
            x, w, window_strides=(1, 1), padding=((1, 1), (1, 1)),
            dimension_numbers=("NCHW", "OIHW", "NCHW"))
        return y + b[None, :, None, None]

    def lrelu(x):
        return jnp.where(x > 0, x, 0.2 * x)

    y = lrelu(conv(x_nchw, w1_oihw, b1))
    y = lrelu(conv(y, w2_oihw, b2))
    return y


if __name__ == "__main__":
    # ConvBlock(dim=2, in_channel=4, out_channel=8, kernel_size=3, stride=1)
    N, Cin, Cout, H, W = 2, 4, 8, 16, 16

    key = jax.random.PRNGKey(0)
    kx, kw1, kb1, kw2, kb2 = jax.random.split(key, 5)

    x = jax.random.normal(kx, (N, Cin, H, W), dtype=jnp.float32)
    # Parameters in PyTorch nn.Conv2d layout: weight OIHW, bias (Cout,).
    w1 = jax.random.normal(kw1, (Cout, Cin, 3, 3), dtype=jnp.float32) * 0.1
    b1 = jax.random.normal(kb1, (Cout,), dtype=jnp.float32) * 0.1
    w2 = jax.random.normal(kw2, (Cout, Cout, 3, 3), dtype=jnp.float32) * 0.1
    b2 = jax.random.normal(kb2, (Cout,), dtype=jnp.float32) * 0.1

    out = conv_block_forward(x, w1, b1, w2, b2)
    out = jax.block_until_ready(out)

    ref = _reference_forward(x, w1, b1, w2, b2)
    assert out.shape == (N, Cout, H, W)
    assert jnp.allclose(out, ref, atol=1e-4, rtol=1e-4), "mismatch vs reference"

    print("KERNEL_OK")
</pallas_src>

<mosaic_0001>
module attributes {stable_mosaic.version = 11 : i64} {
  func.func @kernel(%arg0: i32, %arg1: memref<1x4x256xf32, #tpu.memory_space<vmem>>, %arg2: memref<8x36xf32, #tpu.memory_space<vmem>>, %arg3: memref<8x1xf32, #tpu.memory_space<vmem>>, %arg4: memref<8x72xf32, #tpu.memory_space<vmem>>, %arg5: memref<8x1xf32, #tpu.memory_space<vmem>>, %arg6: memref<1x8x256xf32, #tpu.memory_space<vmem>>) attributes {dimension_semantics = [#tpu.dimension_semantics<parallel>], iteration_bounds = array<i64: 2>, scalar_prefetch = 0 : i64, scratch_operands = 0 : i64, tpu.core_type = #tpu.core_type<tc>, window_params = [{transform_indices = @transform_0, window_bounds = array<i64: 1, 4, 256>}, {pipeline_mode = #tpu.pipeline_mode<synchronous>, transform_indices = @transform_1, window_bounds = array<i64: 8, 36>}, {pipeline_mode = #tpu.pipeline_mode<synchronous>, transform_indices = @transform_2, window_bounds = array<i64: 8, 1>}, {pipeline_mode = #tpu.pipeline_mode<synchronous>, transform_indices = @transform_3, window_bounds = array<i64: 8, 72>}, {pipeline_mode = #tpu.pipeline_mode<synchronous>, transform_indices = @transform_4, window_bounds = array<i64: 8, 1>}, {transform_indices = @transform_5, window_bounds = array<i64: 1, 8, 256>}]} {
    %0 = tpu.iota {dimensions = array<i32: 1>} : vector<1x256xi32>
    %c16_i32 = arith.constant 16 : i32
    %c0_i32 = arith.constant 0 : i32
    %1 = arith.cmpi eq, %c16_i32, %c0_i32 : i32
    %c1_i32 = arith.constant 1 : i32
    %2 = arith.select %1, %c1_i32, %c16_i32 : i32
    %3 = vector.broadcast %2 : i32 to vector<1x256xi32>
    %4 = arith.remsi %0, %3 : vector<1x256xi32>
    %c0_i32_0 = arith.constant 0 : i32
    %5 = vector.broadcast %c0_i32_0 : i32 to vector<1x256xi32>
    %6 = arith.cmpi ne, %4, %5 : vector<1x256xi32>
    %c0_i32_1 = arith.constant 0 : i32
    %7 = vector.broadcast %c0_i32_1 : i32 to vector<1x256xi32>
    %8 = arith.cmpi slt, %4, %7 : vector<1x256xi32>
    %c0_i32_2 = arith.constant 0 : i32
    %9 = arith.cmpi slt, %2, %c0_i32_2 : i32
    %10 = vector.broadcast %9 : i1 to vector<1x256xi1>
    %11 = vector.broadcast %10 : vector<1x256xi1> to vector<1x256xi1>
    %12 = arith.xori %8, %11 : vector<1x256xi1>
    %13 = arith.andi %12, %6 : vector<1x256xi1>
    %14 = vector.broadcast %2 : i32 to vector<1x256xi32>
    %15 = arith.addi %4, %14 : vector<1x256xi32>
    %16 = arith.select %13, %15, %4 : vector<1x256xi1>, vector<1x256xi32>
    %c1_i32_3 = arith.constant 1 : i32
    %17 = vector.broadcast %c1_i32_3 : i32 to vector<1x256xi32>
    %18 = arith.cmpi sge, %16, %17 : vector<1x256xi32>
    %c14_i32 = arith.constant 14 : i32
    %19 = vector.broadcast %c14_i32 : i32 to vector<1x256xi32>
    %20 = arith.cmpi sle, %16, %19 : vector<1x256xi32>
    %c0 = arith.constant 0 : index
    %c0_4 = arith.constant 0 : index
    %c0_5 = arith.constant 0 : index
    %21 = vector.load %arg1[%c0, %c0_4, %c0_5] : memref<1x4x256xf32, #tpu.memory_space<vmem>>, vector<1x4x256xf32>
    %22 = vector.shape_cast %21 : vector<1x4x256xf32> to vector<4x256xf32>
    %c0_6 = arith.constant 0 : index
    %c0_7 = arith.constant 0 : index
    %23 = vector.load %arg2[%c0_6, %c0_7] : memref<8x36xf32, #tpu.memory_space<vmem>>, vector<8x36xf32>
    %c0_8 = arith.constant 0 : index
    %c0_9 = arith.constant 0 : index
    %24 = vector.load %arg3[%c0_8, %c0_9] : memref<8x1xf32, #tpu.memory_space<vmem>>, vector<8x1xf32>
    %cst = arith.constant 0.000000e+00 : f32
    %25 = vector.broadcast %cst : f32 to vector<4x17xf32>
    %26 = tpu.concatenate %25, %22, %25 in 1 : vector<4x17xf32>, vector<4x256xf32>, vector<4x17xf32> -> vector<4x290xf32>
    %27 = vector.extract_strided_slice %26 {offsets = [0, 0], sizes = [4, 256], strides = [1, 1]} : vector<4x290xf32> to vector<4x256xf32>
    %cst_10 = arith.constant 0.000000e+00 : f32
    %28 = vector.shape_cast %18 : vector<1x256xi1> to vector<1x256xi1>
    %29 = vector.broadcast %28 : vector<1x256xi1> to vector<4x256xi1>
    %30 = vector.broadcast %cst_10 : f32 to vector<4x256xf32>
    %31 = arith.select %29, %27, %30 : vector<4x256xi1>, vector<4x256xf32>
    %32 = vector.extract_strided_slice %26 {offsets = [0, 1], sizes = [4, 256], strides = [1, 1]} : vector<4x290xf32> to vector<4x256xf32>
    %33 = vector.extract_strided_slice %26 {offsets = [0, 2], sizes = [4, 256], strides = [1, 1]} : vector<4x290xf32> to vector<4x256xf32>
    %cst_11 = arith.constant 0.000000e+00 : f32
    %34 = vector.shape_cast %20 : vector<1x256xi1> to vector<1x256xi1>
    %35 = vector.broadcast %34 : vector<1x256xi1> to vector<4x256xi1>
    %36 = vector.broadcast %cst_11 : f32 to vector<4x256xf32>
    %37 = arith.select %35, %33, %36 : vector<4x256xi1>, vector<4x256xf32>
    %38 = vector.extract_strided_slice %26 {offsets = [0, 16], sizes = [4, 256], strides = [1, 1]} : vector<4x290xf32> to vector<4x256xf32>
    %cst_12 = arith.constant 0.000000e+00 : f32
    %39 = vector.shape_cast %18 : vector<1x256xi1> to vector<1x256xi1>
    %40 = vector.broadcast %39 : vector<1x256xi1> to vector<4x256xi1>
    %41 = vector.broadcast %cst_12 : f32 to vector<4x256xf32>
    %42 = arith.select %40, %38, %41 : vector<4x256xi1>, vector<4x256xf32>
    %43 = vector.extract_strided_slice %26 {offsets = [0, 17], sizes = [4, 256], strides = [1, 1]} : vector<4x290xf32> to vector<4x256xf32>
    %44 = vector.extract_strided_slice %26 {offsets = [0, 18], sizes = [4, 256], strides = [1, 1]} : vector<4x290xf32> to vector<4x256xf32>
    %cst_13 = arith.constant 0.000000e+00 : f32
    %45 = vector.shape_cast %20 : vector<1x256xi1> to vector<1x256xi1>
    %46 = vector.broadcast %45 : vector<1x256xi1> to vector<4x256xi1>
    %47 = vector.broadcast %cst_13 : f32 to vector<4x256xf32>
    %48 = arith.select %46, %44, %47 : vector<4x256xi1>, vector<4x256xf32>
    %49 = vector.extract_strided_slice %26 {offsets = [0, 32], sizes = [4, 256], strides = [1, 1]} : vector<4x290xf32> to vector<4x256xf32>
    %cst_14 = arith.constant 0.000000e+00 : f32
    %50 = vector.shape_cast %18 : vector<1x256xi1> to vector<1x256xi1>
    %51 = vector.broadcast %50 : vector<1x256xi1> to vector<4x256xi1>
    %52 = vector.broadcast %cst_14 : f32 to vector<4x256xf32>
    %53 = arith.select %51, %49, %52 : vector<4x256xi1>, vector<4x256xf32>
    %54 = vector.extract_strided_slice %26 {offsets = [0, 33], sizes = [4, 256], strides = [1, 1]} : vector<4x290xf32> to vector<4x256xf32>
    %55 = vector.extract_strided_slice %26 {offsets = [0, 34], sizes = [4, 256], strides = [1, 1]} : vector<4x290xf32> to vector<4x256xf32>
    %cst_15 = arith.constant 0.000000e+00 : f32
    %56 = vector.shape_cast %20 : vector<1x256xi1> to vector<1x256xi1>
    %57 = vector.broadcast %56 : vector<1x256xi1> to vector<4x256xi1>
    %58 = vector.broadcast %cst_15 : f32 to vector<4x256xf32>
    %59 = arith.select %57, %55, %58 : vector<4x256xi1>, vector<4x256xf32>
    %60 = tpu.concatenate %31, %32, %37, %42, %43, %48, %53, %54, %59 in 0 : vector<4x256xf32>, vector<4x256xf32>, vector<4x256xf32>, vector<4x256xf32>, vector<4x256xf32>, vector<4x256xf32>, vector<4x256xf32>, vector<4x256xf32>, vector<4x256xf32> -> vector<36x256xf32>
    %cst_16 = arith.constant dense<0.000000e+00> : vector<8x256xf32>
    %61 = tpu.matmul %23, %60, %cst_16 {dimension_numbers = #tpu.dot_dimension_numbers<[1], [0], [0], [1], [0, 0, 1, 1], [], []>} : vector<8x36xf32>, vector<36x256xf32>, vector<8x256xf32> -> vector<8x256xf32>
    %62 = vector.broadcast %24 : vector<8x1xf32> to vector<8x256xf32>
    %63 = arith.addf %61, %62 : vector<8x256xf32>
    %cst_17 = arith.constant 2.000000e-01 : f32
    %64 = vector.broadcast %cst_17 : f32 to vector<8x256xf32>
    %65 = arith.mulf %64, %63 : vector<8x256xf32>
    %66 = arith.maximumf %63, %65 : vector<8x256xf32>
    %c0_18 = arith.constant 0 : index
    %c0_19 = arith.constant 0 : index
    %67 = vector.load %arg4[%c0_18, %c0_19] : memref<8x72xf32, #tpu.memory_space<vmem>>, vector<8x72xf32>
    %c0_20 = arith.constant 0 : index
    %c0_21 = arith.constant 0 : index
    %68 = vector.load %arg5[%c0_20, %c0_21] : memref<8x1xf32, #tpu.memory_space<vmem>>, vector<8x1xf32>
    %cst_22 = arith.constant 0.000000e+00 : f32
    %69 = vector.broadcast %cst_22 : f32 to vector<8x17xf32>
    %70 = tpu.concatenate %69, %66, %69 in 1 : vector<8x17xf32>, vector<8x256xf32>, vector<8x17xf32> -> vector<8x290xf32>
    %71 = vector.extract_strided_slice %70 {offsets = [0, 0], sizes = [8, 256], strides = [1, 1]} : vector<8x290xf32> to vector<8x256xf32>
    %cst_23 = arith.constant 0.000000e+00 : f32
    %72 = vector.shape_cast %18 : vector<1x256xi1> to vector<1x256xi1>
    %73 = vector.broadcast %72 : vector<1x256xi1> to vector<8x256xi1>
    %74 = vector.broadcast %cst_23 : f32 to vector<8x256xf32>
    %75 = arith.select %73, %71, %74 : vector<8x256xi1>, vector<8x256xf32>
    %76 = vector.extract_strided_slice %70 {offsets = [0, 1], sizes = [8, 256], strides = [1, 1]} : vector<8x290xf32> to vector<8x256xf32>
    %77 = vector.extract_strided_slice %70 {offsets = [0, 2], sizes = [8, 256], strides = [1, 1]} : vector<8x290xf32> to vector<8x256xf32>
    %cst_24 = arith.constant 0.000000e+00 : f32
    %78 = vector.shape_cast %20 : vector<1x256xi1> to vector<1x256xi1>
    %79 = vector.broadcast %78 : vector<1x256xi1> to vector<8x256xi1>
    %80 = vector.broadcast %cst_24 : f32 to vector<8x256xf32>
    %81 = arith.select %79, %77, %80 : vector<8x256xi1>, vector<8x256xf32>
    %82 = vector.extract_strided_slice %70 {offsets = [0, 16], sizes = [8, 256], strides = [1, 1]} : vector<8x290xf32> to vector<8x256xf32>
    %cst_25 = arith.constant 0.000000e+00 : f32
    %83 = vector.shape_cast %18 : vector<1x256xi1> to vector<1x256xi1>
    %84 = vector.broadcast %83 : vector<1x256xi1> to vector<8x256xi1>
    %85 = vector.broadcast %cst_25 : f32 to vector<8x256xf32>
    %86 = arith.select %84, %82, %85 : vector<8x256xi1>, vector<8x256xf32>
    %87 = vector.extract_strided_slice %70 {offsets = [0, 17], sizes = [8, 256], strides = [1, 1]} : vector<8x290xf32> to vector<8x256xf32>
    %88 = vector.extract_strided_slice %70 {offsets = [0, 18], sizes = [8, 256], strides = [1, 1]} : vector<8x290xf32> to vector<8x256xf32>
    %cst_26 = arith.constant 0.000000e+00 : f32
    %89 = vector.shape_cast %20 : vector<1x256xi1> to vector<1x256xi1>
    %90 = vector.broadcast %89 : vector<1x256xi1> to vector<8x256xi1>
    %91 = vector.broadcast %cst_26 : f32 to vector<8x256xf32>
    %92 = arith.select %90, %88, %91 : vector<8x256xi1>, vector<8x256xf32>
    %93 = vector.extract_strided_slice %70 {offsets = [0, 32], sizes = [8, 256], strides = [1, 1]} : vector<8x290xf32> to vector<8x256xf32>
    %cst_27 = arith.constant 0.000000e+00 : f32
    %94 = vector.shape_cast %18 : vector<1x256xi1> to vector<1x256xi1>
    %95 = vector.broadcast %94 : vector<1x256xi1> to vector<8x256xi1>
    %96 = vector.broadcast %cst_27 : f32 to vector<8x256xf32>
    %97 = arith.select %95, %93, %96 : vector<8x256xi1>, vector<8x256xf32>
    %98 = vector.extract_strided_slice %70 {offsets = [0, 33], sizes = [8, 256], strides = [1, 1]} : vector<8x290xf32> to vector<8x256xf32>
    %99 = vector.extract_strided_slice %70 {offsets = [0, 34], sizes = [8, 256], strides = [1, 1]} : vector<8x290xf32> to vector<8x256xf32>
    %cst_28 = arith.constant 0.000000e+00 : f32
    %100 = vector.shape_cast %20 : vector<1x256xi1> to vector<1x256xi1>
    %101 = vector.broadcast %100 : vector<1x256xi1> to vector<8x256xi1>
    %102 = vector.broadcast %cst_28 : f32 to vector<8x256xf32>
    %103 = arith.select %101, %99, %102 : vector<8x256xi1>, vector<8x256xf32>
    %104 = tpu.concatenate %75, %76, %81, %86, %87, %92, %97, %98, %103 in 0 : vector<8x256xf32>, vector<8x256xf32>, vector<8x256xf32>, vector<8x256xf32>, vector<8x256xf32>, vector<8x256xf32>, vector<8x256xf32>, vector<8x256xf32>, vector<8x256xf32> -> vector<72x256xf32>
    %cst_29 = arith.constant dense<0.000000e+00> : vector<8x256xf32>
    %105 = tpu.matmul %67, %104, %cst_29 {dimension_numbers = #tpu.dot_dimension_numbers<[1], [0], [0], [1], [0, 0, 1, 1], [], []>} : vector<8x72xf32>, vector<72x256xf32>, vector<8x256xf32> -> vector<8x256xf32>
    %106 = vector.broadcast %68 : vector<8x1xf32> to vector<8x256xf32>
    %107 = arith.addf %105, %106 : vector<8x256xf32>
    %cst_30 = arith.constant 2.000000e-01 : f32
    %108 = vector.broadcast %cst_30 : f32 to vector<8x256xf32>
    %109 = arith.mulf %108, %107 : vector<8x256xf32>
    %110 = arith.maximumf %107, %109 : vector<8x256xf32>
    %c0_31 = arith.constant 0 : index
    %c0_32 = arith.constant 0 : index
    %c0_33 = arith.constant 0 : index
    %111 = vector.load %arg6[%c0_31, %c0_32, %c0_33] : memref<1x8x256xf32, #tpu.memory_space<vmem>>, vector<1x8x256xf32>
    %112 = vector.shape_cast %111 : vector<1x8x256xf32> to vector<8x256xf32>
    %113 = vector.shape_cast %110 : vector<8x256xf32> to vector<1x8x256xf32>
    tpu.vector_store %arg6[%c0_31, %c0_32, %c0_33], %113 {strides = array<i32>} : memref<1x8x256xf32, #tpu.memory_space<vmem>>, vector<1x8x256xf32>,
    return
  }
  func.func @transform_0(%arg0: i32) -> (i32, i32, i32) {
    %c0_i32 = arith.constant 0 : i32
    %c0_i32_0 = arith.constant 0 : i32
    %c0_i32_1 = arith.constant 0 : i32
    return %arg0, %c0_i32, %c0_i32_0 : i32, i32, i32
  }
  func.func @transform_1(%arg0: i32) -> (i32, i32) {
    %c0_i32 = arith.constant 0 : i32
    %c0_i32_0 = arith.constant 0 : i32
    %c0_i32_1 = arith.constant 0 : i32
    return %c0_i32, %c0_i32_0 : i32, i32
  }
  func.func @transform_2(%arg0: i32) -> (i32, i32) {
    %c0_i32 = arith.constant 0 : i32
    %c0_i32_0 = arith.constant 0 : i32
    %c0_i32_1 = arith.constant 0 : i32
    return %c0_i32, %c0_i32_0 : i32, i32
  }
  func.func @transform_3(%arg0: i32) -> (i32, i32) {
    %c0_i32 = arith.constant 0 : i32
    %c0_i32_0 = arith.constant 0 : i32
    %c0_i32_1 = arith.constant 0 : i32
    return %c0_i32, %c0_i32_0 : i32, i32
  }
  func.func @transform_4(%arg0: i32) -> (i32, i32) {
    %c0_i32 = arith.constant 0 : i32
    %c0_i32_0 = arith.constant 0 : i32
    %c0_i32_1 = arith.constant 0 : i32
    return %c0_i32, %c0_i32_0 : i32, i32
  }
  func.func @transform_5(%arg0: i32) -> (i32, i32, i32) {
    %c0_i32 = arith.constant 0 : i32
    %c0_i32_0 = arith.constant 0 : i32
    %c0_i32_1 = arith.constant 0 : i32
    return %arg0, %c0_i32, %c0_i32_0 : i32, i32, i32
  }
}

</mosaic_0001>

<bundles_post_ra>
// kernel: tpu_custom_call.1
= control target key start
LH: loop header
LB: loop body
LE: loop exit
PB: predicated region body
PF: predicated region fallthrough
CT: control target
= control target key end

     0   :  { %10 = vsyncpa [#allocation3], 0  ;;  %s1392_s0 = inlined_call_operand.vmem [shape: f32[2,4,256], index: 0, kind: input, shape index: {}]   ;;  %s1393_s1 = inlined_call_operand.hbm [shape: f32[8,36], index: 1, kind: input, shape index: {}]   ;;  %s1394_s2 = inlined_call_operand.vmem [shape: f32[8,1], index: 2, kind: input, shape index: {}]   ;;  %s1395_s3 = inlined_call_operand.hbm [shape: f32[8,72], index: 3, kind: input, shape index: {}]   ;;  %s1396_s4 = inlined_call_operand.vmem [shape: f32[8,1], index: 4, kind: input, shape index: {}]   ;;  %s1397_s5 = inlined_call_operand.hbm [shape: f32[2,8,256], index: 5, kind: output, shape index: {}]  }
   0x1   :  { %11 = vsyncpa [#allocation6], 0 }
   0x2   :  { %12 = vsyncpa [#allocation4], 0 }
   0x3   :  { %14 = vsyncpa [#allocation4 + $0x1], 0  ;;  %s1088_s18 = smov 0   ;;  %s1090_s19 = smov 0  }
   0x4   :  { %s1092_s20 = smov 0   ;;  %s1094_s21 = smov 0  }
   0x5 LB: > { %s1109_s22 = sadd.s32 4294967295, %s1044_s21   ;;  %s756_s23 = sadd.s32 4294967294, %s1044_s21   ;;  %s1044_s21 = sphi %s1094_s21, %s1412_s21   ;;  %s1040_s20 = sphi %s1092_s20, %s1411_s20   ;;  %s1036_s19 = sphi %s1090_s19, %s1410_s19   ;;  %s1032_s18 = sphi %s1088_s18, %s1409_s18  }
   0x6   : > { %s1113_s24 = sadd.s32 1, %s1044_s21   ;;  %s137_s25 = sadd.s32 1, %s1040_s20 }
   0x7   : > { %s134_s26 = ssub.s32 %s1044_s21, %s1113_s24  ;;  %p147_p0 = scmp.ne.s32.totalorder %s1040_s20, %s1036_s19 }
   0x8   : > { %p135_p1 = scmp.eq.s32.totalorder %s134_s26, 0  ;;  %p148_p2 = scmp.eq.s32.totalorder %s1109_s22, 1 }
   0x9   : > { %p153_p3 = scmp.ne.s32.totalorder %s1036_s19, %s1032_s18  ;;  %p154_p4 = scmp.eq.s32.totalorder %s756_s23, 1 }
   0xa   : > { %s1124_s27 = scalar_select %p135_p1, %s1040_s20, %s137_s25  }
   0xb   : > { %p1126_p5 = por %p148_p2, %p147_p0  ;;  %p1130_p6 = por %p154_p4, %p153_p3 }
   0xc   : > { %p757_p7 = scmp.ge.s32.totalorder %s1044_s21, 1  ;;  %p161_p8 = scmp.lt.s32.totalorder %s1044_s21, 3 }
   0xd   : > { %p813_p9 = scmp.eq.s32.totalorder %s1109_s22, 0  ;;  %s173_s8 = sshll.u32 %s1393_s1, 4  ;;  %s174_s8 = int_to_ptr.hbm [resolvable:$true] %s173_s8 }
   0xe   : > { %p1137_p10 = pnand %p757_p7, %p161_p8  ;;  %s1046_s9 = smov [#allocation2]  }
   0xf   : > { %s175_s10 = sshll.u32 %s1046_s9, 4  ;;  %s188_s13 = sshll.u32 %s1395_s3, 4  ;;  %s176_s10 = int_to_ptr.vmem [resolvable:$true] %s175_s10  ;;  %s189_s13 = int_to_ptr.hbm [resolvable:$true] %s188_s13 }
  0x10   : > { %p802_p11 = pneg %p1137_p10  ;;  %s1047_s14 = smov [#allocation5]  }
  0x11   : > { %s190_s15 = sshll.u32 %s1047_s14, 4  ;;  %214 = sbr.rel (%p1137_p10) target bundleno = 874 (0x36a), region = 40  ;;  %s191_s15 = int_to_ptr.vmem [resolvable:$true] %s190_s15 }
  0x12   : > { %p803_p12 = pnand %p813_p9, %p802_p11 }
  0x14   : > { %805 = dma.hbm_to_vmem [thread:$0]  (!%p803_p12), %s174_s8, 128, %s176_s10, [#allocation3]  }
  0x15   : > { %808 = dma.hbm_to_vmem [thread:$0]  (!%p803_p12), %s189_s13, 128, %s191_s15, [#allocation6]  }
  0x16   : > { %1019 = dma.done.wait (%p813_p9), [#allocation3], 128  }
  0x17   : > { %1021 = vsyncadd (%p813_p9), [#allocation3], 4294967168 }
  0x18   : > { %1023 = dma.done.wait (%p813_p9), [#allocation6], 128  }
  0x19   : > { %1025 = vsyncadd (%p813_p9), [#allocation6], 4294967168  ;;  %p248_p13 = scmp.lt.s32.totalorder %s1109_s22, 1  ;;  %s1048_s30 = smov 17   ;;  %vm295_vm0 = vcmask 138240   ;;  %v253_v15 = vlaneseq  ;;  %vm372_vm1 = vcmask 769024  }
  0x1a   : > { %s1049_s6 = smov 94   ;;  %s1050_s7 = smov 110   ;;  %vm427_vm3 = vcmask 1043456   ;;  %v286_v32 = vld [vmem:[%s1394_s2] sm:$0xff]  ;;  %v1057_v34 = vmov 0   ;;  %vm346_vm5 = vcmask 900096  }
  0x1b   : > { %s249_s16 = scalar_select %p248_p13, %s1109_s22, 1  ;;  %v254_v17 = vand.u32 127, %v253_v15  ;;  %897 = vset.pattern.permute.xlu1 %v1057_v34  ;;  %913 = vset.pattern.permute.xlu0 %v1057_v34  ;;  %vm333_vm6 = vcmask 916480   ;;  %vm359_vm7 = vcmask 785408   ;;  %vm405_vm10 = vcmask 908288  }
  0x1c   : > { %s1051_s8 = smov 112   ;;  %s1052_s9 = smov 96   ;;  %vm320_vm11 = vcmask 1031168   ;;  %vm422_vm12 = vcmask 777216   ;;  %vm388_vm13 = vcmask 1039360   ;;  %vm441_vm14 = vcmask 293888  }
  0x1d   : > { %s790_s17 = sshll.u32 %s249_s16, 3  ;;  %s1053_s10 = smov 126   ;;  %v255_v19 = vadd.s32 128, %v254_v17  ;;  %v260_v23 = vand.u32 15, %v254_v17  ;;  %vm608_vm15 = vcmask 588800  }
  0x1e   : > { %s252_s26 = scalar_lea.vmem %s1392_s0, %s790_s17  ;;  %s1054_s11 = smov 111  }
  0x1f   : > { %v284_v0 = vld [vmem:[%s252_s26] sm:$0xff]  ;;  %s1055_s12 = smov 95   ;;  %s1056_s13 = smov 127   ;;  %v267_v20 = vand.u32 15, %v255_v19  ;;  %vm1202_vm4 = vcmp.le.s32.totalorder %v260_v23, 14  ;;  %vm1220_vm8 = vcmp.ge.s32.totalorder %v260_v23, 1 }
  0x20   : > { %288 = vst [vmem:[#allocation1] ss:$2 sm:$0xff] %v284_v0  ;;  %s245_s23 = sand.u32 1, %s1036_s19   ;;  %s791_s26 = sshll.u32 %s1109_s22, 4 }
  0x21   : > { %vm1198_vm2 = vcmp.le.s32.totalorder %v267_v20, 14  ;;  %vm1225_vm9 = vcmp.ge.s32.totalorder %v267_v20, 1  ;;  %s764_s25 = sshll.u32 %s245_s23, 4  ;;  %s994_s15 = scalar_lea.hbm %s1397_s5, 32 }
  0x27   : > { %v289_v1 = vld.sshfl [vmem:[#allocation1] sm:$0xff pattern:$0x75316420]  ;;  %v290_v2 = vld.sshfl [vmem:[#allocation1 + $0x8] sm:$0xff pattern:$0x75316420] }
  0x28   : > { %291 = vrot.lane.b32.xlu0 %v289_v1, %s1048_s30 }
  0x30   : > { %293 = vrot.lane.b32.xlu0 %v290_v2, %s1048_s30 }
  0x9a   : > { %v292_v3 = vpop.permute.xlu0 %291 }
  0x9b   : > { %v1169_v4 = vsel %vm295_vm0, 0.0, %v292_v3 }
  0x9c   : > { %366 = vrot.lane.b32.xlu1 %v1169_v4, %s1049_s6  ;;  %v379_v10 = vrot.slane %v1169_v4, 4 }
  0xa2   : > { %v294_v5 = vpop.permute.xlu0 %293 }
  0xa3   : > { %v1174_v6 = vsel %vm295_vm0, %v292_v3, %v294_v5  ;;  %v301_v7 = vsel %vm295_vm0, %v294_v5, 0.0 }
  0xa4   : > { %344 = vrot.lane.b32.xlu0 %v301_v7, %s1050_s7  ;;  %370 = vrot.lane.b32.xlu2 %v301_v7, %s1049_s6  ;;  %v862_v8 = vpack.i.bf16 %v1174_v6, %v1169_v4  ;;  %v380_v9 = vrot.slane %v1174_v6, 4  ;;  %v381_v12 = vrot.slane %v301_v7, 4 }
  0xa5   : > { %368 = vrot.lane.b32.xlu1 %v1174_v6, %s1049_s6 }
  0xa6   : > { %v887_v11 = vpack.i.bf16 %v380_v9, %v379_v10 }
  0xac   : > { %331 = vrot.lane.b32.xlu0 %v301_v7, %s1051_s8  ;;  %863 = vrot.lane.b32.xlu2 %v862_v8, %s1050_s7 }
  0xad   : > { %868 = vrot.lane.b32.xlu1 %v862_v8, %s1052_s9 }
  0xb4   : > { %883 = vrot.lane.b32.xlu0 %v862_v8, %s1053_s10  ;;  %357 = vrot.lane.b32.xlu2 %v301_v7, %s1052_s9 }
  0xb5   : > { %878 = vrot.lane.b32.xlu1 %v862_v8, %s1054_s11 }
  0xbc   : > { %873 = vrot.lane.b32.xlu2 %v862_v8, %s1051_s8  ;;  %888 = vrot.lane.b32.xlu0 %v887_v11, %s1055_s12 }
  0xbd   : > { %420 = vrot.lane.b32.xlu1 %v381_v12, %s1055_s12 }
  0xc4   : > { %403 = vrot.lane.b32.xlu2 %v301_v7, %s1054_s11  ;;  %386 = vrot.lane.b32.xlu0 %v381_v12, %s1056_s13 }
  0xc5   : > { %318 = vrot.lane.b32.xlu1 %v301_v7, %s1053_s10 }
  0xcc   : > { %893 = vrot.lane.b32.xlu2 %v887_v11, %s1056_s13 }
  0xcd   : > { %438 = vperm.xlu1 %897, %v286_v32  }
  0xfe   : > { %v371_v13 = vpop.permute.xlu2 %370 }
 0x106   : > { %v864_v14 = vpop.permute.xlu2 %863 }
 0x107   : > { %v866_v35 = vunpack.i.h.bf16 %v864_v14  ;;  %v865_v36 = vunpack.i.l.bf16 %v864_v14 }
 0x109   : > { %v347_v40 = vsel %vm346_vm5, %v865_v36, %v866_v35 }
 0x10a   : > { %v351_v48 = vsel %vm1202_vm4, %v347_v40, 0.0 }
 0x10b   : > { %v412_v59 = vrot.slane %v351_v48, 4 }
 0x10e   : > { %v367_v16 = vpop.permute.xlu1 %366  ;;  %v358_v18 = vpop.permute.xlu2 %357 }
 0x116   : > { %v345_v22 = vpop.permute.xlu0 %344  ;;  %v874_v28 = vpop.permute.xlu2 %873 }
 0x117   : > { %v369_v24 = vpop.permute.xlu1 %368  ;;  %v876_v41 = vunpack.i.h.bf16 %v874_v28  ;;  %v875_v42 = vunpack.i.l.bf16 %v874_v28  ;;  %v348_v46 = vsel %vm346_vm5, %v866_v35, %v345_v22 }
 0x118   : > { %v373_v26 = vsel %vm372_vm1, %v367_v16, %v369_v24  ;;  %v374_v27 = vsel %vm372_vm1, %v369_v24, %v371_v13  ;;  %v352_v57 = vsel %vm1198_vm2, %v348_v46, 0.0 }
 0x119   : > { %v377_v29 = vsel %vm1202_vm4, %v373_v26, 0.0  ;;  %v378_v30 = vsel %vm1198_vm2, %v374_v27, 0.0  ;;  %v334_v52 = vsel %vm333_vm6, %v875_v42, %v876_v41  ;;  %v413_v11 = vrot.slane %v352_v57, 4  ;;  %v285_v27 = vld [vmem:[#allocation2] sm:$0xff] }
 0x11a   : > { %767 = vmatpush.msk.msra.mxu0 %vm427_vm3, %v377_v29  ;;  %769 = vmatpush.msk.msra.mxu1 %vm427_vm3, %v378_v30  ;;  %v338_v0 = vsel %vm1220_vm8, %v334_v52, 0.0  ;;  %v306_v26 = vsel %vm1220_vm8, %v1169_v4, 0.0  ;;  %v307_v4 = vsel %vm1225_vm9, %v1174_v6, 0.0 }
 0x11e   : > { %v332_v31 = vpop.permute.xlu0 %331  ;;  %v404_v37 = vpop.permute.xlu2 %403 }
 0x11f   : > { %v869_v33 = vpop.permute.xlu1 %868  ;;  %v335_v12 = vsel %vm333_vm6, %v876_v41, %v332_v31 }
 0x120   : > { %v871_v43 = vunpack.i.h.bf16 %v869_v33  ;;  %v870_v44 = vunpack.i.l.bf16 %v869_v33  ;;  %v339_v19 = vsel %vm1225_vm9, %v335_v12, 0.0 }
 0x121   : > { %v396_v28 = vrot.slane %v339_v19, 4 }
 0x122   : > { %v360_v51 = vsel %vm359_vm7, %v870_v44, %v871_v43  ;;  %v361_v56 = vsel %vm359_vm7, %v871_v43, %v358_v18  ;;  %v395_v18 = vrot.slane %v338_v0, 4 }
 0x123   : > { %v364_v63 = vsel %vm1220_vm8, %v360_v51, 0.0  ;;  %v365_v3 = vsel %vm1225_vm9, %v361_v56, 0.0  ;;  %v496_v51 = vld [vmem:[%s1396_s4] sm:$0xff] }
 0x126   : > { %v1217_v38 = vpop.permute.xlu0 %883  ;;  %v894_v55 = vpop.permute.xlu2 %893 }
 0x127   : > { %v879_v39 = vpop.permute.xlu1 %878  ;;  %v886_v49 = vunpack.i.h.bf16 %v1217_v38  ;;  %v885_v50 = vunpack.i.l.bf16 %v1217_v38  ;;  %v896_v1 = vunpack.i.h.bf16 %v894_v55  ;;  %v895_v2 = vunpack.i.l.bf16 %v894_v55 }
 0x128   : > { %v881_v53 = vunpack.i.h.bf16 %v879_v39  ;;  %v880_v54 = vunpack.i.l.bf16 %v879_v39 }
 0x129   : > { %v321_v5 = vsel %vm320_vm11, %v885_v50, %v886_v49  ;;  %v389_v20 = vsel %vm388_vm13, %v895_v2, %v896_v1 }
 0x12a   : > { %v406_v9 = vsel %vm405_vm10, %v880_v54, %v881_v53  ;;  %v407_v10 = vsel %vm405_vm10, %v881_v53, %v404_v37  ;;  %v325_v15 = vsel %vm1202_vm4, %v321_v5, 0.0  ;;  %v428_v30 = vsel %vm427_vm3, %v306_v26, %v389_v20 }
 0x12b   : > { %v432_v16 = vsel %vm427_vm3, %v406_v9, %v412_v59  ;;  %v433_v17 = vsel %vm427_vm3, %v407_v10, %v413_v11  ;;  %v430_v23 = vsel %vm427_vm3, %v325_v15, %v395_v18 }
 0x12e   : > { %v889_v58 = vpop.permute.xlu0 %888 }
 0x12f   : > { %v421_v60 = vpop.permute.xlu1 %420  ;;  %v891_v61 = vunpack.i.h.bf16 %v889_v58  ;;  %v890_v62 = vunpack.i.l.bf16 %v889_v58 }
 0x131   : > { %v423_v7 = vsel %vm422_vm12, %v890_v62, %v891_v61  ;;  %v424_v8 = vsel %vm422_vm12, %v891_v61, %v421_v60 }
 0x132   : > { %v434_v13 = vsel %vm427_vm3, %v364_v63, %v423_v7  ;;  %v435_v14 = vsel %vm427_vm3, %v365_v3, %v424_v8 }
 0x133   : > { %463 = vmatpush.msra.mxu0 %v434_v13  ;;  %483 = vmatpush.msra.mxu1 %v435_v14 }
 0x135   : > { %464 = vmatpush.msra.mxu0 %v432_v16  ;;  %484 = vmatpush.msra.mxu1 %v433_v17 }
 0x136   : > { %v387_v22 = vpop.permute.xlu0 %386 }
 0x137   : > { %v319_v24 = vpop.permute.xlu1 %318  ;;  %465 = vmatpush.msra.mxu0 %v430_v23  ;;  %v390_v31 = vsel %vm388_vm13, %v896_v1, %v387_v22 }
 0x138   : > { %v322_v29 = vsel %vm320_vm11, %v886_v49, %v319_v24  ;;  %v429_v34 = vsel %vm427_vm3, %v307_v4, %v390_v31 }
 0x139   : > { %466 = vmatpush.msra.mxu0 %v428_v30  ;;  %v326_v32 = vsel %vm1198_vm2, %v322_v29, 0.0 }
 0x13a   : > { %v431_v33 = vsel %vm427_vm3, %v326_v32, %v396_v28  ;;  %768 = vmatmul.msk.f32.vlgmr.msra.gmra.mxu0 %vm441_vm14, %v285_v27 }
 0x13b   : > { %485 = vmatpush.msra.mxu1 %v431_v33  ;;  %v495_v33 = vld [vmem:[#allocation5] sm:$0xff] }
 0x13d   : > { %486 = vmatpush.msra.mxu1 %v429_v34 }
 0x13e   : > { %770 = vmatmul.msk.f32.vlgmr.msra.gmra.mxu1 %vm441_vm14, %v285_v27 }
 0x13f   : > { %v439_v35 = vpop.permute.xlu1 %438 }
 0x1b7   : > { %v468_v36 = vpop.f32.mrf.mxu0 }
 0x1b8   : > { %v469_v37 = vadd.f32 %v468_v36, %v439_v35 }
 0x1ba   : > { %v491_v38 = vmul.f32 0.2, %v469_v37 }
 0x1bb   : > { %v488_v39 = vpop.f32.mrf.mxu1 }
 0x1bc   : > { %v493_v40 = vmax.f32 %v469_v37, %v491_v38  ;;  %v489_v41 = vadd.f32 %v488_v39, %v439_v35 }
 0x1be   : > { %v492_v42 = vmul.f32 0.2, %v489_v41  ;;  %499 = vrot.lane.b32.xlu2 %v493_v40, %s1048_s30 }
 0x1c0   : > { %v494_v43 = vmax.f32 %v489_v41, %v492_v42 }
 0x1c2   : > { %501 = vrot.lane.b32.xlu0 %v494_v43, %s1048_s30 }
 0x218   : > { %v500_v44 = vpop.permute.xlu2 %499 }
 0x219   : > { %v1276_v6 = vsel %vm295_vm0, 0.0, %v500_v44 }
 0x21a   : > { %561 = vrot.lane.b32.xlu1 %v1276_v6, %s1049_s6 }
 0x234   : > { %v502_v46 = vpop.permute.xlu0 %501 }
 0x235   : > { %v1281_v48 = vsel %vm295_vm0, %v500_v44, %v502_v46  ;;  %v508_v49 = vsel %vm295_vm0, %v502_v46, 0.0 }
 0x236   : > { %565 = vrot.lane.b32.xlu0 %v508_v49, %s1049_s6  ;;  %563 = vrot.lane.b32.xlu2 %v1281_v48, %s1049_s6  ;;  %v898_v50 = vpack.i.bf16 %v1281_v48, %v1276_v6 }
 0x238   : > { %899 = vrot.lane.b32.xlu1 %v898_v50, %s1055_s12 }
 0x23e   : > { %549 = vrot.lane.b32.xlu0 %v1276_v6, %s1052_s9  ;;  %597 = vrot.lane.b32.xlu2 %v508_v49, %s1055_s12 }
 0x240   : > { %551 = vrot.lane.b32.xlu1 %v1281_v48, %s1052_s9 }
 0x246   : > { %537 = vrot.lane.b32.xlu0 %v1276_v6, %s1050_s7  ;;  %553 = vrot.lane.b32.xlu2 %v508_v49, %s1052_s9 }
 0x248   : > { %539 = vrot.lane.b32.xlu1 %v1281_v48, %s1050_s7 }
 0x24e   : > { %904 = vrot.lane.b32.xlu0 %v898_v50, %s1054_s11  ;;  %541 = vrot.lane.b32.xlu2 %v508_v49, %s1050_s7  ;;  %s670_s7 = scalar_lea.hbm %s1397_s5, %s791_s26 }
 0x250   : > { %587 = vrot.lane.b32.xlu1 %v508_v49, %s1054_s11  ;;  %s659_s11 = scalar_lea.sflag [#allocation4], %s245_s23 }
 0x256   : > { %527 = vrot.lane.b32.xlu0 %v1281_v48, %s1051_s8  ;;  %525 = vrot.lane.b32.xlu2 %v1276_v6, %s1051_s8 }
 0x258   : > { %529 = vrot.lane.b32.xlu1 %v508_v49, %s1051_s8  ;;  %s247_s8 = scalar_lea.vmem [#allocation7], %s764_s25 }
 0x259   : > { %s672_s9 = sshll.u32 %s247_s8, 4  ;;  %s673_s9 = int_to_ptr.vmem [resolvable:$true] %s672_s9 }
 0x25e   : > { %515 = vrot.lane.b32.xlu0 %v1281_v48, %s1053_s10  ;;  %513 = vrot.lane.b32.xlu2 %v1276_v6, %s1053_s10 }
 0x260   : > { %517 = vrot.lane.b32.xlu1 %v508_v49, %s1053_s10  ;;  %s674_s10 = sshll.u32 %s670_s7, 4  ;;  %s675_s10 = int_to_ptr.hbm [resolvable:$true] %s674_s10 }
 0x261   : > { %s988_s22 = sshra.s32 %s675_s10, 4  ;;  %s989_s22 = int_to_ptr.hbm [resolvable:$true] %s988_s22 }
 0x262   : > { %s990_s12 = scalar_lea.hbm %s989_s22, 16  ;;  %p995_p3 = scmp.lt.s32.totalorder %s989_s22, %s1397_s5 }
 0x263   : > { %p991_p0 = scmp.ne.s32.totalorder %s989_s22, %s990_s12  ;;  %p996_p4 = scmp.lt.s32.totalorder %s994_s15, %s990_s12 }
 0x265   : > { %p992_p1 = pnand %p991_p0, %p1126_p5  ;;  %p997_p7 = por %p996_p4, %p995_p3 }
 0x266   : > { %577 = vrot.lane.b32.xlu0 %v508_v49, %s1056_s13  ;;  %909 = vrot.lane.b32.xlu2 %v898_v50, %s1056_s13 }
 0x267   : > { %p993_p2 = pneg %p992_p1 }
 0x268   : > { %605 = vperm.xlu1 %897, %v496_v51  }
 0x269   : > { %p998_p8 = pnand %p997_p7, %p993_p2 }
 0x28c   : > { %v562_v52 = vpop.permute.xlu1 %561 }
 0x290   : > { %v564_v53 = vpop.permute.xlu2 %563 }
 0x291   : > { %v567_v54 = vsel %vm372_vm1, %v562_v52, %v564_v53 }
 0x292   : > { %771 = vmatpush.msk.msra.mxu2 %vm1202_vm4, %v567_v54 }
 0x298   : > { %v598_v55 = vpop.permute.xlu2 %597 }
 0x2a0   : > { %v554_v56 = vpop.permute.xlu2 %553 }
 0x2a8   : > { %v566_v57 = vpop.permute.xlu0 %565  ;;  %v542_v0 = vpop.permute.xlu2 %541 }
 0x2a9   : > { %v568_v58 = vsel %vm372_vm1, %v564_v53, %v566_v57 }
 0x2aa   : > { %v900_v59 = vpop.permute.xlu1 %899  ;;  %778 = vmatpush.msk.msra.mxu3 %vm1198_vm2, %v568_v58 }
 0x2ab   : > { %v902_v60 = vunpack.i.h.bf16 %v900_v59  ;;  %v901_v61 = vunpack.i.l.bf16 %v900_v59 }
 0x2ad   : > { %v599_v62 = vsel %vm422_vm12, %v901_v61, %v902_v60  ;;  %v600_v63 = vsel %vm422_vm12, %v902_v60, %v598_v55 }
 0x2ae   : > { %620 = vmatpush.msra.mxu2 %v599_v62  ;;  %640 = vmatpush.msra.mxu3 %v600_v63 }
 0x2b0   : > { %v550_v1 = vpop.permute.xlu0 %549  ;;  %v526_v7 = vpop.permute.xlu2 %525 }
 0x2b2   : > { %v552_v2 = vpop.permute.xlu1 %551 }
 0x2b3   : > { %v555_v3 = vsel %vm359_vm7, %v550_v1, %v552_v2  ;;  %v556_v5 = vsel %vm359_vm7, %v552_v2, %v554_v56 }
 0x2b4   : > { %772 = vmatpush.msk.msra.mxu2 %vm1220_vm8, %v555_v3  ;;  %779 = vmatpush.msk.msra.mxu3 %vm1225_vm9, %v556_v5 }
 0x2b8   : > { %v538_v8 = vpop.permute.xlu0 %537  ;;  %v514_v15 = vpop.permute.xlu2 %513 }
 0x2ba   : > { %v540_v9 = vpop.permute.xlu1 %539 }
 0x2bb   : > { %v543_v10 = vsel %vm346_vm5, %v538_v8, %v540_v9  ;;  %v544_v11 = vsel %vm346_vm5, %v540_v9, %v542_v0 }
 0x2bc   : > { %773 = vmatpush.msk.msra.mxu2 %vm1202_vm4, %v543_v10  ;;  %780 = vmatpush.msk.msra.mxu3 %vm1198_vm2, %v544_v11 }
 0x2c0   : > { %v905_v12 = vpop.permute.xlu0 %904  ;;  %v910_v24 = vpop.permute.xlu2 %909 }
 0x2c1   : > { %v907_v13 = vunpack.i.h.bf16 %v905_v12  ;;  %v906_v14 = vunpack.i.l.bf16 %v905_v12  ;;  %v912_v26 = vunpack.i.h.bf16 %v910_v24  ;;  %v911_v27 = vunpack.i.l.bf16 %v910_v24 }
 0x2c2   : > { %v588_v16 = vpop.permute.xlu1 %587 }
 0x2c3   : > { %v589_v17 = vsel %vm405_vm10, %v906_v14, %v907_v13  ;;  %v590_v18 = vsel %vm405_vm10, %v907_v13, %v588_v16  ;;  %v579_v31 = vsel %vm388_vm13, %v911_v27, %v912_v26 }
 0x2c4   : > { %623 = vmatpush.msra.mxu2 %v589_v17  ;;  %643 = vmatpush.msra.mxu3 %v590_v18 }
 0x2c8   : > { %v528_v19 = vpop.permute.xlu0 %527 }
 0x2c9   : > { %v531_v20 = vsel %vm333_vm6, %v526_v7, %v528_v19 }
 0x2ca   : > { %v530_v22 = vpop.permute.xlu1 %529  ;;  %774 = vmatpush.msk.msra.mxu2 %vm1220_vm8, %v531_v20 }
 0x2cb   : > { %v532_v23 = vsel %vm333_vm6, %v528_v19, %v530_v22 }
 0x2cc   : > { %781 = vmatpush.msk.msra.mxu3 %vm1225_vm9, %v532_v23 }
 0x2d0   : > { %v516_v28 = vpop.permute.xlu0 %515 }
 0x2d1   : > { %v519_v29 = vsel %vm320_vm11, %v514_v15, %v516_v28 }
 0x2d2   : > { %v518_v30 = vpop.permute.xlu1 %517  ;;  %775 = vmatpush.msk.msra.mxu2 %vm1202_vm4, %v519_v29 }
 0x2d3   : > { %v520_v32 = vsel %vm320_vm11, %v516_v28, %v518_v30 }
 0x2d4   : > { %626 = vmatpush.msra.mxu2 %v579_v31  ;;  %782 = vmatpush.msk.msra.mxu3 %vm1198_vm2, %v520_v32 }
 0x2d6   : > { %776 = vmatpush.msk.msra.mxu2 %vm1220_vm8, %v1276_v6 }
 0x2d7   : > { %777 = vmatmul.msk.f32.vlgmr.msra.gmra.mxu2 %vm608_vm15, %v495_v33 }
 0x2d8   : > { %v578_v4 = vpop.permute.xlu0 %577 }
 0x2d9   : > { %v580_v25 = vsel %vm388_vm13, %v912_v26, %v578_v4 }
 0x2da   : > { %646 = vmatpush.msra.mxu3 %v580_v25  ;;  %v606_v21 = vpop.permute.xlu1 %605 }
 0x2dc   : > { %783 = vmatpush.msk.msra.mxu3 %vm1225_vm9, %v1281_v48 }
 0x2dd   : > { %784 = vmatmul.msk.f32.vlgmr.msra.gmra.mxu3 %vm608_vm15, %v495_v33 }
 0x35a   : > { %v629_v34 = vpop.f32.mrf.mxu2 }
 0x35b   : > { %v630_v35 = vadd.f32 %v629_v34, %v606_v21 }
 0x35d   : > { %v652_v36 = vmul.f32 0.2, %v630_v35 }
 0x35f   : > { %v654_v37 = vmax.f32 %v630_v35, %v652_v36 }
 0x360   : > { %v649_v45 = vpop.f32.mrf.mxu3 }
 0x361   : > { %656 = vst [vmem:[%s247_s8] sm:$0xff] %v654_v37  ;;  %v650_v38 = vadd.f32 %v649_v45, %v606_v21 }
 0x363   : > { %v653_v47 = vmul.f32 0.2, %v650_v38 }
 0x365   : > { %v655_v39 = vmax.f32 %v650_v38, %v653_v47 }
 0x367   : > { %657 = vst [vmem:[%s247_s8 + $0x8] sm:$0xff] %v655_v39 }
 0x368   : > { %1001 = shalt.err (!%p998_p8)
}
 0x369   : > { %800 = dma.vmem_to_hbm [thread:$0]  (%p1126_p5), %s673_s9, 256, %s675_s10, %s659_s11  }
 0x36a PF: > { %p817_p9 = scmp.ge.s32.totalorder %s1044_s21, 2  ;;  %s686_s23 = sand.u32 1, %s1032_s18  }
 0x36b   : > { %s687_s25 = scalar_lea.sflag [#allocation4], %s686_s23 }
 0x36c   : > { %p810_p10 = pnand %p817_p9, %p1130_p6 }
 0x36e   : > { %p811_p11 = pneg %p810_p10 }
 0x370   : > { %1027 = dma.done.wait (%p811_p11), %s687_s25, 256  }
 0x371   : > { %1029 = vsyncadd (%p811_p11), %s687_s25, 4294967040  ;;  %p17_p12 = scmp.ge.s32.totalorder %s1113_s24, 4   ;;  %s1409_s18 = smov %s1036_s19 }
 0x372   : > { %s1410_s19 = smov %s1040_s20  ;;  %s1411_s20 = smov %s1124_s27 }
 0x373   : > { %s1412_s21 = smov %s1113_s24  ;;  %19 = sbr.rel (!%p17_p12) target bundleno = 5 (0x5), region = 84 }
 0x378   :  { %693 = vsyncpa [#allocation3], 1 }
 0x379   :  { %695 = vsyncpa [#allocation3 + $0x1], 1 }
 0x37a   :  { %696 = vsyncpa [#allocation6], 1 }
 0x37b   :  { %697 = vsyncpa [#allocation4], 1 }
 0x37c   :  { %699 = vsyncpa [#allocation4 + $0x1], 1 }

</bundles_post_ra>
